<compile_context>
chip_gen: v7x
topology: tpu7x:2x2x1
jax: 0.10.0
libtpu: 0.0.40
codegen_flags: <defaults>
</compile_context>

<pallas_src>
import functools
import math

import jax
import jax.numpy as jnp
import numpy as np
from jax import lax
from jax.experimental import pallas as pl
from jax.experimental.pallas import tpu as pltpu


def _knn_vote_kernel(x_ref, mem_ref, lab_ref, out_ref, *, k, temperature):
    # x_ref:   (TB, D)     raw (un-normalized) features for this batch tile
    # mem_ref: (Q,  D)     queue memory (grid-invariant block)
    # lab_ref: (Q,  1)     int32 memory labels (grid-invariant block)
    # out_ref: (TB, C_pad) padded class scores
    x = x_ref[...].astype(jnp.float32)

    # F.normalize(x): x / max(||x||, 1e-12)  ==  x * rsqrt(max(sum(x^2), 1e-24)).
    ssq = jnp.sum(x * x, axis=1, keepdims=True)
    s = jnp.maximum(ssq, jnp.float32(1e-24))
    r = lax.rsqrt(s)
    r = r * (jnp.float32(1.5) - jnp.float32(0.5) * s * r * r)  # 1 NR step: full f32 accuracy
    xn = x * r

    mem = mem_ref[...]
    # dist[b, q] = <xn[b], memory[q]>   (MXU; bf16 memory is supported, f32 accumulate)
    dist = lax.dot_general(
        xn.astype(mem.dtype), mem, (((1,), (1,)), ((), ())),
        preferred_element_type=jnp.float32)                       # (TB, Q)

    tb, q = dist.shape
    c_pad = out_ref.shape[-1]

    # ---- one-time work hoisted off the serial top-k chain --------------------------
    w0 = jnp.max(dist, axis=1, keepdims=True)                     # global max == top-1 value
    inv_t = jnp.float32(1.0 / temperature)
    p = jnp.exp((dist - w0) * inv_t)                              # softmax numerators (EUP)

    # Monotone f32->int32 key with the reversed queue index packed into the low
    # ceil(log2(Q)) bits: one integer max per iteration yields both the winner and a
    # deterministic min-index tie-break.  Ordering can differ from exact float ordering
    # only for values equal in all but the low log2(Q) mantissa bits; the softmax weights
    # themselves always come from the exact `p`.
    qbits = max(int(q - 1).bit_length(), 1)
    bits = pltpu.bitcast(dist, jnp.int32)
    skey = jnp.where(bits < 0, bits ^ jnp.int32(0x7FFFFFFF), bits)
    idx_rev = (q - 1) - lax.broadcasted_iota(jnp.int32, (tb, q), 1)
    ckey = (skey & jnp.int32(-(1 << qbits))) | idx_rev

    neg_key = jnp.int32(-(2 ** 31))                # strictly below every valid key
    wsel = jnp.zeros((tb, q), jnp.float32)         # softmax numerators at the k winners

    # k is small & static -> unrolled; exactly ONE cross-lane reduce per iteration,
    # no MXU op, no exp, no divide on the loop-carried chain.
    for _ in range(k):
        mk = jnp.max(ckey, axis=1, keepdims=True)  # (TB, 1) integer max
        sel = ckey == mk                           # exact one-hot (keys are unique)
        wsel = jnp.where(sel, p, wsel)
        ckey = jnp.where(sel, neg_key, ckey)

    denom = jnp.sum(wsel, axis=1, keepdims=True)   # (TB, 1); >= 1 since top-1 has p == 1

    # ---- single deferred label matmul: (TB,Q) @ (Q,C_pad) on the MXU ----------------
    lab = lab_ref[...]                                             # (Q, 1) int32
    class_iota = lax.broadcasted_iota(jnp.int32, (q, c_pad), 1)
    lab1h = (lab == class_iota).astype(jnp.float32)                # one-hot built in-kernel
    acc = jnp.dot(wsel, lab1h, preferred_element_type=jnp.float32)  # (TB, C_pad)

    pred = acc * pl.reciprocal(denom)                              # exact reciprocal
    pred = jnp.minimum(pred + jnp.float32(1e-5), jnp.float32(1.0))  # (p + 1e-5).clamp(max=1)
    out_ref[...] = pred.astype(out_ref.dtype)


def momentum_queue_forward(x, memory, memory_label, *, temperature, k, classes):
    """Pallas implementation of MomentumQueue.forward (top-k branch, eps_ball > 1)."""
    B, D = x.shape
    Q, D2 = memory.shape
    assert D == D2
    assert k <= Q, "k must not exceed queue_size (torch.topk would also fail)"

    c_pad = ((classes + 127) // 128) * 128          # lane-dense output / one-hot width
    tb = 8 if B % 8 == 0 else B                     # batch tile (sublane-aligned)
    assert B % tb == 0
    grid = (B // tb,)

    labels = memory_label.astype(jnp.int32).reshape(Q, 1)

    kernel = functools.partial(_knn_vote_kernel, k=k, temperature=temperature)
    out = pl.pallas_call(
        kernel,
        out_shape=jax.ShapeDtypeStruct((B, c_pad), jnp.float32),
        grid=grid,
        in_specs=[
            pl.BlockSpec((tb, D), lambda i: (i, 0)),
            pl.BlockSpec((Q, D), lambda i: (0, 0)),   # grid-invariant: not re-fetched per step
            pl.BlockSpec((Q, 1), lambda i: (0, 0)),   # int32 labels (no HBM one-hot)
        ],
        out_specs=pl.BlockSpec((tb, c_pad), lambda i: (i, 0)),
        compiler_params=pltpu.CompilerParams(dimension_semantics=("parallel",)),
    )(x, memory, labels)
    return out[:, :classes]


def _reference_forward(x, memory, memory_label, *, temperature, k, classes):
    xn = x / jnp.maximum(jnp.linalg.norm(x, axis=1, keepdims=True), 1e-12)
    dist = xn @ memory.T
    w, idx = jax.lax.top_k(dist, k)
    labels = memory_label[idx]
    sw = jax.nn.softmax(w / temperature, axis=1)
    oh = jax.nn.one_hot(labels, classes, dtype=jnp.float32)
    pred = jnp.sum(oh * sw[..., None], axis=1)
    return jnp.minimum(pred + 1e-5, 1.0)


if __name__ == "__main__":
    # Small, module-consistent shapes (args.hidden_dim / memeory_size / memeory_temp / ...).
    feature_dim = 32
    queue_size = 128
    temperature = 0.07
    k = 5
    classes = 8
    batch = 16          # -> grid=(2,), exercises the parallel batch tiling

    key = jax.random.PRNGKey(0)
    kx, kmem, klab = jax.random.split(key, 3)

    # __init__: memory ~ U(-stdv, stdv) with stdv = 1/sqrt(feature_dim/3)
    stdv = 1.0 / math.sqrt(feature_dim / 3)
    memory = jax.random.uniform(
        kmem, (queue_size, feature_dim), jnp.float32, minval=-stdv, maxval=stdv
    )
    # __init__ sets memory_label = zeros; use random labels so the vote is non-trivial.
    memory_label = jax.random.randint(klab, (queue_size,), 0, classes, dtype=jnp.int32)

    x = jax.random.normal(kx, (batch, feature_dim), jnp.float32)

    out = jax.block_until_ready(
        momentum_queue_forward(
            x, memory, memory_label, temperature=temperature, k=k, classes=classes
        )
    )
    ref = jax.block_until_ready(
        _reference_forward(
            x, memory, memory_label, temperature=temperature, k=k, classes=classes
        )
    )
    np.testing.assert_allclose(np.asarray(out), np.asarray(ref), rtol=2e-5, atol=2e-5)

    print("KERNEL_OK")
</pallas_src>

<mosaic_0001>
module attributes {stable_mosaic.version = 11 : i64} {
  func.func @_knn_vote_kernel(%arg0: i32, %arg1: memref<8x32xf32, #tpu.memory_space<vmem>>, %arg2: memref<128x32xf32, #tpu.memory_space<vmem>>, %arg3: memref<128x1xi32, #tpu.memory_space<vmem>>, %arg4: memref<8x128xf32, #tpu.memory_space<vmem>>) attributes {dimension_semantics = [#tpu.dimension_semantics<parallel>], iteration_bounds = array<i64: 2>, scalar_prefetch = 0 : i64, scratch_operands = 0 : i64, tpu.core_type = #tpu.core_type<tc>, window_params = [{transform_indices = @transform_0, window_bounds = array<i64: 8, 32>}, {pipeline_mode = #tpu.pipeline_mode<synchronous>, transform_indices = @transform_1, window_bounds = array<i64: 128, 32>}, {pipeline_mode = #tpu.pipeline_mode<synchronous>, transform_indices = @transform_2, window_bounds = array<i64: 128, 1>}, {transform_indices = @transform_3, window_bounds = array<i64: 8, 128>}]} {
    %c0 = arith.constant 0 : index
    %c0_0 = arith.constant 0 : index
    %0 = vector.load %arg1[%c0, %c0_0] : memref<8x32xf32, #tpu.memory_space<vmem>>, vector<8x32xf32>
    %1 = arith.mulf %0, %0 : vector<8x32xf32>
    %cst = arith.constant dense<0.000000e+00> : vector<8xf32>
    %2 = vector.multi_reduction <add>, %1, %cst [1] : vector<8x32xf32> to vector<8xf32>
    %3 = vector.shape_cast %2 : vector<8xf32> to vector<8x1xf32>
    %cst_1 = arith.constant 1.000000e-24 : f32
    %4 = vector.broadcast %cst_1 : f32 to vector<8x1xf32>
    %5 = arith.maximumf %3, %4 : vector<8x1xf32>
    %6 = math.rsqrt %5 : vector<8x1xf32>
    %cst_2 = arith.constant 5.000000e-01 : f32
    %7 = vector.broadcast %cst_2 : f32 to vector<8x1xf32>
    %8 = arith.mulf %7, %5 : vector<8x1xf32>
    %9 = arith.mulf %8, %6 : vector<8x1xf32>
    %10 = arith.mulf %9, %6 : vector<8x1xf32>
    %cst_3 = arith.constant 1.500000e+00 : f32
    %11 = vector.broadcast %cst_3 : f32 to vector<8x1xf32>
    %12 = arith.subf %11, %10 : vector<8x1xf32>
    %13 = arith.mulf %6, %12 : vector<8x1xf32>
    %14 = vector.broadcast %13 : vector<8x1xf32> to vector<8x32xf32>
    %15 = arith.mulf %0, %14 : vector<8x32xf32>
    %c0_4 = arith.constant 0 : index
    %c0_5 = arith.constant 0 : index
    %16 = vector.load %arg2[%c0_4, %c0_5] : memref<128x32xf32, #tpu.memory_space<vmem>>, vector<128x32xf32>
    %cst_6 = arith.constant dense<0.000000e+00> : vector<8x128xf32>
    %17 = tpu.matmul %15, %16, %cst_6 {dimension_numbers = #tpu.dot_dimension_numbers<[1], [1], [0], [0], [0, 0, 1, 0], [], []>} : vector<8x32xf32>, vector<128x32xf32>, vector<8x128xf32> -> vector<8x128xf32>
    %cst_7 = arith.constant dense<0xFF800000> : vector<8xf32>
    %18 = vector.multi_reduction <maximumf>, %17, %cst_7 [1] : vector<8x128xf32> to vector<8xf32>
    %19 = vector.shape_cast %18 : vector<8xf32> to vector<8x1xf32>
    %20 = vector.broadcast %19 : vector<8x1xf32> to vector<8x128xf32>
    %21 = arith.subf %17, %20 : vector<8x128xf32>
    %cst_8 = arith.constant 14.2857141 : f32
    %22 = vector.broadcast %cst_8 : f32 to vector<8x128xf32>
    %23 = arith.mulf %21, %22 : vector<8x128xf32>
    %24 = math.exp %23 : vector<8x128xf32>
    %25 = tpu.bitcast %17 : vector<8x128xf32> -> vector<8x128xi32>
    %c0_i32 = arith.constant 0 : i32
    %26 = vector.broadcast %c0_i32 : i32 to vector<8x128xi32>
    %27 = arith.cmpi slt, %25, %26 : vector<8x128xi32>
    %c2147483647_i32 = arith.constant 2147483647 : i32
    %28 = vector.broadcast %c2147483647_i32 : i32 to vector<8x128xi32>
    %29 = arith.xori %25, %28 : vector<8x128xi32>
    %30 = arith.select %27, %29, %25 : vector<8x128xi1>, vector<8x128xi32>
    %31 = tpu.iota {dimensions = array<i32: 1>} : vector<8x128xi32>
    %c127_i32 = arith.constant 127 : i32
    %32 = vector.broadcast %c127_i32 : i32 to vector<8x128xi32>
    %33 = arith.subi %32, %31 : vector<8x128xi32>
    %c-128_i32 = arith.constant -128 : i32
    %34 = vector.broadcast %c-128_i32 : i32 to vector<8x128xi32>
    %35 = arith.andi %30, %34 : vector<8x128xi32>
    %36 = arith.ori %35, %33 : vector<8x128xi32>
    %cst_9 = arith.constant 0.000000e+00 : f32
    %37 = vector.broadcast %cst_9 : f32 to vector<8x128xf32>
    %cst_10 = arith.constant dense<-2147483648> : vector<8xi32>
    %38 = vector.multi_reduction <maxsi>, %36, %cst_10 [1] : vector<8x128xi32> to vector<8xi32>
    %39 = vector.shape_cast %38 : vector<8xi32> to vector<8x1xi32>
    %40 = vector.broadcast %39 : vector<8x1xi32> to vector<8x128xi32>
    %41 = arith.cmpi eq, %36, %40 : vector<8x128xi32>
    %42 = arith.select %41, %24, %37 : vector<8x128xi1>, vector<8x128xf32>
    %c-2147483648_i32 = arith.constant -2147483648 : i32
    %43 = vector.broadcast %c-2147483648_i32 : i32 to vector<8x128xi32>
    %44 = arith.select %41, %43, %36 : vector<8x128xi1>, vector<8x128xi32>
    %cst_11 = arith.constant dense<-2147483648> : vector<8xi32>
    %45 = vector.multi_reduction <maxsi>, %44, %cst_11 [1] : vector<8x128xi32> to vector<8xi32>
    %46 = vector.shape_cast %45 : vector<8xi32> to vector<8x1xi32>
    %47 = vector.broadcast %46 : vector<8x1xi32> to vector<8x128xi32>
    %48 = arith.cmpi eq, %44, %47 : vector<8x128xi32>
    %49 = arith.select %48, %24, %42 : vector<8x128xi1>, vector<8x128xf32>
    %c-2147483648_i32_12 = arith.constant -2147483648 : i32
    %50 = vector.broadcast %c-2147483648_i32_12 : i32 to vector<8x128xi32>
    %51 = arith.select %48, %50, %44 : vector<8x128xi1>, vector<8x128xi32>
    %cst_13 = arith.constant dense<-2147483648> : vector<8xi32>
    %52 = vector.multi_reduction <maxsi>, %51, %cst_13 [1] : vector<8x128xi32> to vector<8xi32>
    %53 = vector.shape_cast %52 : vector<8xi32> to vector<8x1xi32>
    %54 = vector.broadcast %53 : vector<8x1xi32> to vector<8x128xi32>
    %55 = arith.cmpi eq, %51, %54 : vector<8x128xi32>
    %56 = arith.select %55, %24, %49 : vector<8x128xi1>, vector<8x128xf32>
    %c-2147483648_i32_14 = arith.constant -2147483648 : i32
    %57 = vector.broadcast %c-2147483648_i32_14 : i32 to vector<8x128xi32>
    %58 = arith.select %55, %57, %51 : vector<8x128xi1>, vector<8x128xi32>
    %cst_15 = arith.constant dense<-2147483648> : vector<8xi32>
    %59 = vector.multi_reduction <maxsi>, %58, %cst_15 [1] : vector<8x128xi32> to vector<8xi32>
    %60 = vector.shape_cast %59 : vector<8xi32> to vector<8x1xi32>
    %61 = vector.broadcast %60 : vector<8x1xi32> to vector<8x128xi32>
    %62 = arith.cmpi eq, %58, %61 : vector<8x128xi32>
    %63 = arith.select %62, %24, %56 : vector<8x128xi1>, vector<8x128xf32>
    %c-2147483648_i32_16 = arith.constant -2147483648 : i32
    %64 = vector.broadcast %c-2147483648_i32_16 : i32 to vector<8x128xi32>
    %65 = arith.select %62, %64, %58 : vector<8x128xi1>, vector<8x128xi32>
    %cst_17 = arith.constant dense<-2147483648> : vector<8xi32>
    %66 = vector.multi_reduction <maxsi>, %65, %cst_17 [1] : vector<8x128xi32> to vector<8xi32>
    %67 = vector.shape_cast %66 : vector<8xi32> to vector<8x1xi32>
    %68 = vector.broadcast %67 : vector<8x1xi32> to vector<8x128xi32>
    %69 = arith.cmpi eq, %65, %68 : vector<8x128xi32>
    %70 = arith.select %69, %24, %63 : vector<8x128xi1>, vector<8x128xf32>
    %cst_18 = arith.constant dense<0.000000e+00> : vector<8xf32>
    %71 = vector.multi_reduction <add>, %70, %cst_18 [1] : vector<8x128xf32> to vector<8xf32>
    %72 = vector.shape_cast %71 : vector<8xf32> to vector<8x1xf32>
    %c0_19 = arith.constant 0 : index
    %c0_20 = arith.constant 0 : index
    %73 = vector.load %arg3[%c0_19, %c0_20] : memref<128x1xi32, #tpu.memory_space<vmem>>, vector<128x1xi32>
    %74 = tpu.iota {dimensions = array<i32: 1>} : vector<128x128xi32>
    %75 = vector.broadcast %73 : vector<128x1xi32> to vector<128x128xi32>
    %76 = arith.cmpi eq, %75, %74 : vector<128x128xi32>
    %77 = arith.extui %76 : vector<128x128xi1> to vector<128x128xi32>
    %78 = arith.sitofp %77 : vector<128x128xi32> to vector<128x128xf32>
    %cst_21 = arith.constant dense<0.000000e+00> : vector<8x128xf32>
    %79 = tpu.matmul %70, %78, %cst_21 {dimension_numbers = #tpu.dot_dimension_numbers<[1], [0], [0], [1], [0, 0, 1, 1], [], []>} : vector<8x128xf32>, vector<128x128xf32>, vector<8x128xf32> -> vector<8x128xf32>
    %80 = tpu.reciprocal %72 : vector<8x1xf32> -> vector<8x1xf32>
    %81 = vector.broadcast %80 : vector<8x1xf32> to vector<8x128xf32>
    %82 = arith.mulf %79, %81 : vector<8x128xf32>
    %cst_22 = arith.constant 9.99999974E-6 : f32
    %83 = vector.broadcast %cst_22 : f32 to vector<8x128xf32>
    %84 = arith.addf %82, %83 : vector<8x128xf32>
    %cst_23 = arith.constant 1.000000e+00 : f32
    %85 = vector.broadcast %cst_23 : f32 to vector<8x128xf32>
    %86 = arith.minimumf %84, %85 : vector<8x128xf32>
    %c0_24 = arith.constant 0 : index
    %c0_25 = arith.constant 0 : index
    %87 = vector.load %arg4[%c0_24, %c0_25] : memref<8x128xf32, #tpu.memory_space<vmem>>, vector<8x128xf32>
    tpu.vector_store %arg4[%c0_24, %c0_25], %86 {strides = array<i32>} : memref<8x128xf32, #tpu.memory_space<vmem>>, vector<8x128xf32>,
    return
  }
  func.func @transform_0(%arg0: i32) -> (i32, i32) {
    %c0_i32 = arith.constant 0 : i32
    %c0_i32_0 = arith.constant 0 : i32
    return %arg0, %c0_i32 : i32, i32
  }
  func.func @transform_1(%arg0: i32) -> (i32, i32) {
    %c0_i32 = arith.constant 0 : i32
    %c0_i32_0 = arith.constant 0 : i32
    %c0_i32_1 = arith.constant 0 : i32
    return %c0_i32, %c0_i32_0 : i32, i32
  }
  func.func @transform_2(%arg0: i32) -> (i32, i32) {
    %c0_i32 = arith.constant 0 : i32
    %c0_i32_0 = arith.constant 0 : i32
    %c0_i32_1 = arith.constant 0 : i32
    return %c0_i32, %c0_i32_0 : i32, i32
  }
  func.func @transform_3(%arg0: i32) -> (i32, i32) {
    %c0_i32 = arith.constant 0 : i32
    %c0_i32_0 = arith.constant 0 : i32
    return %arg0, %c0_i32 : i32, i32
  }
}

</mosaic_0001>

<bundles_post_ra>
// kernel: tpu_custom_call.1
= control target key start
LH: loop header
LB: loop body
LE: loop exit
PB: predicated region body
PF: predicated region fallthrough
CT: control target
= control target key end

     0   :  { %8 = vsyncpa [#allocation3], 0  ;;  %s1370_s0 = inlined_call_operand.vmem [shape: f32[16,32], index: 0, kind: input, shape index: {}]   ;;  %s1371_s1 = inlined_call_operand.vmem [shape: f32[128,32], index: 1, kind: input, shape index: {}]   ;;  %s1372_s2 = inlined_call_operand.vmem [shape: s32[128,1], index: 2, kind: input, shape index: {}]   ;;  %s1373_s3 = inlined_call_operand.hbm [shape: f32[16,128], index: 3, kind: output, shape index: {}]  }
   0x1   :  { %10 = vsyncpa [#allocation3 + $0x1], 0  ;;  %s1039_s12 = smov 0   ;;  %s1041_s13 = smov 0  }
   0x2   :  { %s1043_s14 = smov 0   ;;  %s1045_s15 = smov 0  }
   0x3 LB: > { %s1060_s16 = sadd.s32 4294967295, %s1011_s15   ;;  %s678_s17 = sadd.s32 4294967294, %s1011_s15   ;;  %s1011_s15 = sphi %s1045_s15, %s1381_s15   ;;  %s1007_s14 = sphi %s1043_s14, %s1380_s14   ;;  %s1003_s13 = sphi %s1041_s13, %s1379_s13   ;;  %s999_s12 = sphi %s1039_s12, %s1378_s12  }
   0x4   : > { %s1064_s18 = sadd.s32 1, %s1011_s15   ;;  %s91_s19 = sadd.s32 1, %s1007_s14 }
   0x5   : > { %s88_s20 = ssub.s32 %s1011_s15, %s1064_s18  ;;  %p101_p0 = scmp.ne.s32.totalorder %s1007_s14, %s1003_s13 }
   0x6   : > { %p89_p1 = scmp.eq.s32.totalorder %s88_s20, 0  ;;  %p102_p2 = scmp.eq.s32.totalorder %s1060_s16, 1 }
   0x7   : > { %p107_p3 = scmp.ne.s32.totalorder %s1003_s13, %s999_s12  ;;  %p108_p4 = scmp.eq.s32.totalorder %s678_s17, 1 }
   0x8   : > { %s1075_s21 = scalar_select %p89_p1, %s1007_s14, %s91_s19  }
   0x9   : > { %p1077_p5 = por %p102_p2, %p101_p0  ;;  %p1081_p6 = por %p108_p4, %p107_p3 }
   0xa   : > { %p681_p7 = scmp.ge.s32.totalorder %s1011_s15, 1  ;;  %p139_p8 = scmp.lt.s32.totalorder %s1011_s15, 3 }
   0xc   : > { %p140_p9 = pnand %p681_p7, %p139_p8 }
   0xd   : > { %p162_p10 = scmp.lt.s32.totalorder (!%p140_p9), %s1060_s16, 1  ;;  %vm168_vm0 = vcmask (!%p140_p9), 261120   ;;  %v180_v0 = vld [vmem:[%s1371_s1] sm:$0xff] (!%p140_p9)  ;;  %v181_v1 = vld [vmem:[%s1371_s1 + $0x8] sm:$0xff] (!%p140_p9)  ;;  %v1013_v3 = vmov (!%p140_p9), 0.0|0.0   ;;  %v182_v5 = vld [vmem:[%s1371_s1 + $0x10] sm:$0xff] (!%p140_p9)  ;;  %v327_v39 = vlaneseq (!%p140_p9) }
   0xe   : > { %143 = sbr.rel (%p140_p9) target bundleno = 2125 (0x84d), region = 32  ;;  %vm1096_vm1 = vmpackc.low (!%p140_p9), %vm168_vm0, %vm168_vm0  ;;  %841 = vmatprep.subr.bf16.mxu0 (!%p140_p9), %v1013_v3  ;;  %v842_v4 = vpack.c.bf16 (!%p140_p9), %v181_v1, %v180_v0  ;;  %873 = vmatprep.subr.bf16.mxu1 (!%p140_p9), %v1013_v3  ;;  %v183_v6 = vld [vmem:[%s1371_s1 + $0x18] sm:$0xff] (!%p140_p9)  ;;  %v184_v11 = vld [vmem:[%s1371_s1 + $0x20] sm:$0xff] (!%p140_p9)  ;;  %vm1014_vm2 = vmmov (!%p140_p9), 0   ;;  %v1015_v25 = vmov (!%p140_p9), 0.0   ;;  %s159_s17 = sand.u32 (!%p140_p9), 1, %s1003_s13  }
   0xf   : > { %v846_v9 = vpack.c.bf16 (!%p140_p9), %v183_v6, %v182_v5  ;;  %v185_v12 = vld [vmem:[%s1371_s1 + $0x28] sm:$0xff] (!%p140_p9)  ;;  %v186_v14 = vld [vmem:[%s1371_s1 + $0x30] sm:$0xff] (!%p140_p9)  ;;  %v187_v15 = vld [vmem:[%s1371_s1 + $0x38] sm:$0xff] (!%p140_p9)  ;;  %803 = vmatprep.mubr.msk.f32.mxu0 (!%p140_p9), %vm1014_vm2, %v1015_v25  ;;  %838 = vmatprep.mubr.msk.f32.mxu1 (!%p140_p9), %vm1014_vm2, %v1015_v25  ;;  %v1173_v40 = vand.u32 (!%p140_p9), 127, %v327_v39  ;;  %s682_s19 = sshll.u32 (!%p140_p9), %s159_s17, 3  ;;  %s734_s20 = sshll.u32 (!%p140_p9), %s1060_s16, 7 }
  0x10   : > { %844 = vmatpush3.bf16.xpose.msk.msra.mxu0 (!%p140_p9), %vm1096_vm1, %v842_v4  ;;  %v850_v13 = vpack.c.bf16 (!%p140_p9), %v185_v12, %v184_v11  ;;  %v854_v16 = vpack.c.bf16 (!%p140_p9), %v187_v15, %v186_v14  ;;  %v188_v17 = vld [vmem:[%s1371_s1 + $0x40] sm:$0xff] (!%p140_p9)  ;;  %v189_v18 = vld [vmem:[%s1371_s1 + $0x48] sm:$0xff] (!%p140_p9)  ;;  %v190_v20 = vld [vmem:[%s1371_s1 + $0x50] sm:$0xff] (!%p140_p9)  ;;  %s161_s24 = scalar_lea.vmem (!%p140_p9), [#allocation2], %s682_s19 }
  0x11   : > { %845 = vmatprep.subr.bf16.mxu0 (!%p140_p9), %v1013_v3  ;;  %v858_v19 = vpack.c.bf16 (!%p140_p9), %v189_v18, %v188_v17  ;;  %v191_v21 = vld [vmem:[%s1371_s1 + $0x58] sm:$0xff] (!%p140_p9)  ;;  %v192_v23 = vld [vmem:[%s1371_s1 + $0x60] sm:$0xff] (!%p140_p9)  ;;  %v193_v24 = vld [vmem:[%s1371_s1 + $0x68] sm:$0xff] (!%p140_p9)  ;;  %v329_v44 = vsub.s32 (!%p140_p9), 127, %v1173_v40  ;;  %s619_s25 = sshll.u32 (!%p140_p9), %s161_s24, 4  ;;  %s1330_s25 = int_to_ptr.vmem [resolvable:$true] %s619_s25 }
  0x12   : > { %v862_v22 = vpack.c.bf16 (!%p140_p9), %v191_v21, %v190_v20  ;;  %v866_v26 = vpack.c.bf16 (!%p140_p9), %v193_v24, %v192_v23  ;;  %v194_v27 = vld [vmem:[%s1371_s1 + $0x70] sm:$0xff] (!%p140_p9)  ;;  %v195_v28 = vld [vmem:[%s1371_s1 + $0x78] sm:$0xff] (!%p140_p9)  ;;  %v431_v39 = vld [vmem:[%s1372_s2 + $0x68] sm:$0xff] (!%p140_p9)  ;;  %s949_s30 = scalar_lea.vmem (!%p140_p9), %s1330_s25, 128 }
  0x13   : > { %v870_v29 = vpack.c.bf16 (!%p140_p9), %v195_v28, %v194_v27  ;;  %v418_v27 = vld [vmem:[%s1372_s2] sm:$0xff] (!%p140_p9)  ;;  %v1016_v28 = vmov (!%p140_p9), 0   ;;  %p950_p11 = scmp.ne.s32.totalorder (!%p140_p9), %s1330_s25, %s949_s30 }
  0x14   : > { %941 = vset.pattern.permute.xlu0 (!%p140_p9), %v1016_v28  ;;  %942 = vset.pattern.permute.xlu1 (!%p140_p9), %v1016_v28 }
  0x15   : > { %s163_s28 = scalar_select %p162_p10, %s1060_s16, 1 }
  0x16   : > { %p951_p12 = pnand %p950_p11, %p1077_p5  ;;  %s1018_s16 = smov [#allocation2]  }
  0x17   : > { %s683_s29 = sshll.u32 %s163_s28, 3  ;;  %s1328_s28 = scalar_lea.hbm %s1373_s3, %s734_s20 }
  0x18   : > { %s165_s9 = scalar_lea.vmem %s1370_s0, %s683_s29  ;;  %848 = vmatpush3.bf16.xpose.msk.msra.mxu0 %vm1096_vm1, %v846_v9  ;;  %s606_s29 = scalar_lea.sflag [#allocation3], %s159_s17 }
  0x19   : > { %v166_v7 = vld [vmem:[%s165_s9] sm:$0xff]  ;;  %849 = vmatprep.subr.bf16.mxu0 %v1013_v3  ;;  %p952_p13 = pneg %p951_p12  ;;  %s953_s4 = sshll.u32 %s1018_s16, 4  ;;  %s954_s4 = int_to_ptr.vmem [resolvable:$false] %s953_s4 }
  0x1a   : > { %v167_v8 = vmul.f32 %v166_v7, %v166_v7  ;;  %s955_s5 = scalar_lea.vmem %s954_s4, 256  ;;  %p956_p0 = scmp.lt.s32.totalorder %s1330_s25, %s954_s4 }
  0x1b   : > { %p957_p1 = scmp.lt.s32.totalorder %s955_s5, %s949_s30 }
  0x1c   : > { %v169_v10 = vsel %vm168_vm0, %v167_v8, 0.0 }
  0x1d   : > { %170 = vadd.xlane.f32.xlu0 %v169_v10  ;;  %p958_p2 = por %p957_p1, %p956_p0 }
  0x1f   : > { %p959_p3 = pnand %p958_p2, %p952_p13 }
  0x20   : > { %852 = vmatpush3.bf16.xpose.msk.msra.mxu0 %vm1096_vm1, %v850_v13 }
  0x21   : > { %853 = vmatprep.subr.bf16.mxu0 %v1013_v3 }
  0x28   : > { %856 = vmatpush3.bf16.xpose.msk.msra.mxu0 %vm1096_vm1, %v854_v16 }
  0x29   : > { %857 = vmatprep.subr.bf16.mxu0 %v1013_v3 }
  0x30   : > { %860 = vmatpush3.bf16.xpose.msk.msra.mxu0 %vm1096_vm1, %v858_v19 }
  0x31   : > { %861 = vmatprep.subr.bf16.mxu0 %v1013_v3 }
  0x38   : > { %864 = vmatpush3.bf16.xpose.msk.msra.mxu0 %vm1096_vm1, %v862_v22 }
  0x39   : > { %865 = vmatprep.subr.bf16.mxu0 %v1013_v3 }
  0x40   : > { %868 = vmatpush3.bf16.xpose.msk.msra.mxu0 %vm1096_vm1, %v866_v26 }
  0x41   : > { %869 = vmatprep.subr.bf16.mxu0 %v1013_v3 }
  0x48   : > { %872 = vmatpush3.bf16.xpose.msk.msra.mxu0 %vm1096_vm1, %v870_v29  ;;  %v420_v29 = vld [vmem:[%s1372_s2 + $0x10] sm:$0xff] }
  0xaa   : > { %v171_v30 = vpop.xlane.xlu0 %170 }
  0xab   : > { %v172_v31 = vmax.f32 %v171_v30, 1e-24  ;;  %v421_v30 = vld [vmem:[%s1372_s2 + $0x18] sm:$0xff] }
  0xad   : > { %943 = vrsqrt.f32 %v172_v31  ;;  %v174_v32 = vmul.f32 0.5, %v172_v31  ;;  %v422_v31 = vld [vmem:[%s1372_s2 + $0x20] sm:$0xff] }
  0xb7   : > { %v944_v33 = vpop.eup %943 }
  0xb8   : > { %v175_v34 = vmul.f32 %v944_v33, %v174_v32  ;;  %v424_v32 = vld [vmem:[%s1372_s2 + $0x30] sm:$0xff] }
  0xba   : > { %v176_v35 = vmul.f32 %v944_v33, %v175_v34  ;;  %v426_v34 = vld [vmem:[%s1372_s2 + $0x40] sm:$0xff] }
  0xbc   : > { %v177_v36 = vsub.f32 1.5, %v176_v35  ;;  %v427_v35 = vld [vmem:[%s1372_s2 + $0x48] sm:$0xff] }
  0xbe   : > { %v178_v37 = vmul.f32 %v944_v33, %v177_v36  ;;  %v425_v33 = vld [vmem:[%s1372_s2 + $0x38] sm:$0xff]  ;;  %v428_v36 = vld [vmem:[%s1372_s2 + $0x50] sm:$0xff] }
  0xc0   : > { %v179_v38 = vmul.f32 %v178_v37, %v166_v7  ;;  %v429_v37 = vld [vmem:[%s1372_s2 + $0x58] sm:$0xff] }
  0xc2   : > { %804 = vmatmul.mubr.msk.f32.vlgmr.msra.gmra.mrb[0].mxu0 %vm168_vm0, %v179_v38  ;;  %v430_v38 = vld [vmem:[%s1372_s2 + $0x60] sm:$0xff] }
 0x195   : > { %v1175_v41 = vpop.f32.mrb[0].mxu0 }
 0x196   : > { %vm324_vm3 = vcmp.lt.s32.totalorder %v1175_v41, 0  ;;  %v325_v42 = vxor.u32 2147483647, %v1175_v41  ;;  %v805_v43 = vpop.f32.mrb[1].mxu0 }
 0x197   : > { %v433_v43 = vld [vmem:[%s1372_s2 + $0x78] sm:$0xff] }
 0x198   : > { %v326_v45 = vsel %vm324_vm3, %v325_v42, %v1175_v41  ;;  %v432_v42 = vld [vmem:[%s1372_s2 + $0x70] sm:$0xff] }
 0x199   : > { %v330_v46 = vand.u32 4294967168, %v326_v45 }
 0x19b   : > { %v1181_v47 = vor.u32 %v330_v46, %v329_v44 }
 0x19d   : > { %v333_v48 = vshra.s32 %v1181_v47, 16  ;;  %v332_v50 = vand.u32 65535, %v1181_v47 }
 0x19f   : > { %v335_v49 = vcvt.s32.f32 %v333_v48  ;;  %v334_v52 = vcvt.s32.f32 %v332_v50 }
 0x1a1   : > { %336 = vmax.xlane.f32.xlu0 %v335_v49 }
 0x22e   : > { %v337_v51 = vpop.xlane.xlu0 %336 }
 0x22f   : > { %vm338_vm4 = vcmp.eq.f32.partialorder %v335_v49, %v337_v51  ;;  %v343_v54 = vcvt.f32.s32 %v337_v51 }
 0x230   : > { %v339_v53 = vsel %vm338_vm4, %v334_v52, -inf }
 0x231   : > { %340 = vmax.xlane.f32.xlu1 %v339_v53  ;;  %v344_v56 = vshll.u32 %v343_v54, 16  ;;  %v419_v53 = vld [vmem:[%s1372_s2 + $0x8] sm:$0xff] }
 0x232   : > { %v423_v54 = vld [vmem:[%s1372_s2 + $0x28] sm:$0xff] }
 0x2be   : > { %v341_v55 = vpop.xlane.xlu1 %340 }
 0x2bf   : > { %v342_v57 = vcvt.f32.s32 %v341_v55 }
 0x2c1   : > { %v1185_v58 = vadd.s32 %v344_v56, %v342_v57 }
 0x2c3   : > { %vm346_vm5 = vcmp.eq.s32.totalorder %v1181_v47, %v1185_v58 }
 0x2c4   : > { %v1193_v59 = vsel %vm346_vm5, 2147483648, %v1181_v47 }
 0x2c5   : > { %v350_v60 = vshra.s32 %v1193_v59, 16  ;;  %v349_v62 = vand.u32 65535, %v1193_v59 }
 0x2c7   : > { %v352_v61 = vcvt.s32.f32 %v350_v60  ;;  %v351_v0 = vcvt.s32.f32 %v349_v62 }
 0x2c9   : > { %353 = vmax.xlane.f32.xlu1 %v352_v61 }
 0x356   : > { %v354_v63 = vpop.xlane.xlu1 %353 }
 0x357   : > { %vm355_vm6 = vcmp.eq.f32.partialorder %v352_v61, %v354_v63  ;;  %v360_v2 = vcvt.f32.s32 %v354_v63 }
 0x358   : > { %v356_v1 = vsel %vm355_vm6, %v351_v0, -inf }
 0x359   : > { %357 = vmax.xlane.f32.xlu0 %v356_v1  ;;  %v361_v5 = vshll.u32 %v360_v2, 16 }
 0x3e6   : > { %v358_v4 = vpop.xlane.xlu0 %357 }
 0x3e7   : > { %v359_v6 = vcvt.f32.s32 %v358_v4 }
 0x3e9   : > { %v1197_v7 = vadd.s32 %v361_v5, %v359_v6 }
 0x3eb   : > { %vm363_vm7 = vcmp.eq.s32.totalorder %v1193_v59, %v1197_v7 }
 0x3ec   : > { %v1205_v8 = vsel %vm363_vm7, 2147483648, %v1193_v59 }
 0x3ed   : > { %v367_v9 = vshra.s32 %v1205_v8, 16  ;;  %v366_v11 = vand.u32 65535, %v1205_v8 }
 0x3ef   : > { %v369_v10 = vcvt.s32.f32 %v367_v9  ;;  %v368_v13 = vcvt.s32.f32 %v366_v11 }
 0x3f1   : > { %370 = vmax.xlane.f32.xlu1 %v369_v10 }
 0x47e   : > { %v371_v12 = vpop.xlane.xlu1 %370 }
 0x47f   : > { %vm372_vm8 = vcmp.eq.f32.partialorder %v369_v10, %v371_v12  ;;  %v377_v15 = vcvt.f32.s32 %v371_v12 }
 0x480   : > { %v373_v14 = vsel %vm372_vm8, %v368_v13, -inf  ;;  %v1017_v13 = vmov 1.0|1.0  }
 0x481   : > { %374 = vmax.xlane.f32.xlu0 %v373_v14  ;;  %v378_v17 = vshll.u32 %v377_v15, 16 }
 0x50e   : > { %v375_v16 = vpop.xlane.xlu0 %374 }
 0x50f   : > { %v376_v18 = vcvt.f32.s32 %v375_v16 }
 0x511   : > { %v1209_v19 = vadd.s32 %v378_v17, %v376_v18 }
 0x513   : > { %vm380_vm9 = vcmp.eq.s32.totalorder %v1205_v8, %v1209_v19 }
 0x514   : > { %v1217_v20 = vsel %vm380_vm9, 2147483648, %v1205_v8 }
 0x515   : > { %v384_v21 = vshra.s32 %v1217_v20, 16  ;;  %v383_v23 = vand.u32 65535, %v1217_v20 }
 0x517   : > { %v386_v22 = vcvt.s32.f32 %v384_v21  ;;  %v385_v25 = vcvt.s32.f32 %v383_v23 }
 0x519   : > { %387 = vmax.xlane.f32.xlu1 %v386_v22 }
 0x5a6   : > { %v388_v24 = vpop.xlane.xlu1 %387 }
 0x5a7   : > { %vm389_vm10 = vcmp.eq.f32.partialorder %v386_v22, %v388_v24  ;;  %v394_v44 = vcvt.f32.s32 %v388_v24 }
 0x5a8   : > { %v390_v26 = vsel %vm389_vm10, %v385_v25, -inf }
 0x5a9   : > { %391 = vmax.xlane.f32.xlu0 %v390_v26  ;;  %v395_v46 = vshll.u32 %v394_v44, 16 }
 0x5bf   : > { %435 = vperm.xlu0 %941, %v418_v27  }
 0x5c3   : > { %441 = vperm.xlu0 %941, %v420_v29  }
 0x5c7   : > { %444 = vperm.xlu0 %941, %v421_v30  }
 0x5cb   : > { %447 = vperm.xlu0 %941, %v422_v31  }
 0x5cf   : > { %453 = vperm.xlu0 %941, %v424_v32  }
 0x5d3   : > { %456 = vperm.xlu0 %941, %v425_v33  }
 0x5d7   : > { %459 = vperm.xlu0 %941, %v426_v34  }
 0x5db   : > { %462 = vperm.xlu0 %941, %v427_v35  }
 0x5df   : > { %465 = vperm.xlu0 %941, %v428_v36  }
 0x5e3   : > { %468 = vperm.xlu0 %941, %v429_v37  }
 0x5e7   : > { %471 = vperm.xlu0 %941, %v430_v38  }
 0x5eb   : > { %474 = vperm.xlu0 %941, %v431_v39  }
 0x5ef   : > { %477 = vperm.xlu0 %941, %v432_v42  }
 0x5f3   : > { %480 = vperm.xlu0 %941, %v433_v43  }
 0x636   : > { %v392_v45 = vpop.xlane.xlu0 %391 }
 0x637   : > { %v393_v48 = vcvt.f32.s32 %v392_v45 }
 0x639   : > { %v1263_v49 = vadd.s32 %v395_v46, %v393_v48 }
 0x63b   : > { %vm397_vm11 = vcmp.eq.s32.totalorder %v1217_v20, %v1263_v49 }
 0x63c   : > { %v1271_v50 = vsel %vm397_vm11, 2147483648, %v1217_v20 }
 0x63d   : > { %v401_v51 = vshra.s32 %v1271_v50, 16  ;;  %v400_v1 = vand.u32 65535, %v1271_v50 }
 0x63e   : > { %v436_v55 = vpop.permute.xlu0 %435 }
 0x63f   : > { %v403_v52 = vcvt.s32.f32 %v401_v51  ;;  %v402_v4 = vcvt.s32.f32 %v400_v1  ;;  %vm482_vm13 = vcmp.eq.s32.totalorder %v436_v55, %v1173_v40 }
 0x641   : > { %404 = vmax.xlane.f32.xlu1 %v403_v52 }
 0x642   : > { %v442_v56 = vpop.permute.xlu0 %441 }
 0x643   : > { %vm484_vm14 = vcmp.eq.s32.totalorder %v442_v56, %v1173_v40 }
 0x645   : > { %317 = vmax.xlane.f32.xlu1 %v1175_v41 }
 0x646   : > { %v445_v57 = vpop.permute.xlu0 %444 }
 0x647   : > { %vm485_vm15 = vcmp.eq.s32.totalorder %v445_v57, %v1173_v40 }
 0x648   : > { %vm877_vm2 = vmpackc.low %vm485_vm15, %vm484_vm14 }
 0x64a   : > { %v448_v60 = vpop.permute.xlu0 %447 }
 0x64b   : > { %vm486_vm3 = vcmp.eq.s32.totalorder %v448_v60, %v1173_v40 }
 0x64e   : > { %v454_v61 = vpop.permute.xlu0 %453 }
 0x64f   : > { %vm488_vm8 = vcmp.eq.s32.totalorder %v454_v61, %v1173_v40 }
 0x652   : > { %v457_v62 = vpop.permute.xlu0 %456 }
 0x653   : > { %vm489_vm10 = vcmp.eq.s32.totalorder %v457_v62, %v1173_v40 }
 0x656   : > { %438 = vperm.xlu1 %942, %v419_v53   ;;  %v460_v63 = vpop.permute.xlu0 %459 }
 0x65a   : > { %450 = vperm.xlu1 %942, %v423_v54   ;;  %v463_v0 = vpop.permute.xlu0 %462 }
 0x65b   : > { %vm491_vm14 = vcmp.eq.s32.totalorder %v463_v0, %v1173_v40 }
 0x65e   : > { %v466_v5 = vpop.permute.xlu0 %465 }
 0x662   : > { %v469_v11 = vpop.permute.xlu0 %468 }
 0x666   : > { %v472_v15 = vpop.permute.xlu0 %471 }
 0x6ce   : > { %v1282_v2 = vpop.xlane.xlu1 %404 }
 0x6cf   : > { %vm406_vm12 = vcmp.eq.f32.partialorder %v403_v52, %v1282_v2  ;;  %v411_v24 = vcvt.f32.s32 %v1282_v2 }
 0x6d0   : > { %v407_v6 = vsel %vm406_vm12, %v402_v4, -inf  ;;  %vm883_vm12 = vmpackc.low %vm489_vm10, %vm488_vm8 }
 0x6d1   : > { %408 = vmax.xlane.f32.xlu1 %v407_v6  ;;  %v412_v26 = vshll.u32 %v411_v24, 16 }
 0x6d2   : > { %v318_v9 = vpop.xlane.xlu1 %317 }
 0x6d3   : > { %v319_v10 = vsub.f32 %v1175_v41, %v318_v9  ;;  %v475_v41 = vpop.permute.xlu0 %474 }
 0x6d5   : > { %v320_v18 = vmul.f32 14.285714, %v319_v10 }
 0x6d6   : > { %v439_v12 = vpop.permute.xlu1 %438 }
 0x6d7   : > { %vm483_vm0 = vcmp.eq.s32.totalorder %v439_v12, %v1173_v40  ;;  %v478_v16 = vpop.permute.xlu0 %477  ;;  %v321_v21 = vmul.f32 1.442695, %v320_v18 }
 0x6d8   : > { %vm874_vm1 = vmpackc.low %vm483_vm0, %vm482_vm13  ;;  %vm490_vm13 = vcmp.eq.s32.totalorder %v460_v63, %v1173_v40  ;;  %vm492_vm0 = vcmp.eq.s32.totalorder %v466_v5, %v1173_v40  ;;  %vm496_vm8 = vcmp.eq.s32.totalorder %v478_v16, %v1173_v40 }
 0x6d9   : > { %875 = vmatpush3.bf16.msk.msra.mxu1 %vm874_vm1, %v1017_v13  ;;  %vm886_vm15 = vmpackc.low %vm491_vm14, %vm490_vm13  ;;  %vm493_vm1 = vcmp.eq.s32.totalorder %v469_v11, %v1173_v40  ;;  %945 = vpow2.f32 %v321_v21 }
 0x6da   : > { %876 = vmatprep.subr.bf16.mxu1 %v1013_v3  ;;  %v451_v14 = vpop.permute.xlu1 %450 }
 0x6db   : > { %vm487_vm4 = vcmp.eq.s32.totalorder %v451_v14, %v1173_v40  ;;  %v481_v17 = vpop.permute.xlu0 %480 }
 0x6dc   : > { %vm880_vm6 = vmpackc.low %vm487_vm4, %vm486_vm3  ;;  %vm494_vm3 = vcmp.eq.s32.totalorder %v472_v15, %v1173_v40  ;;  %vm495_vm4 = vcmp.eq.s32.totalorder %v475_v41, %v1173_v40  ;;  %vm497_vm10 = vcmp.eq.s32.totalorder %v481_v17, %v1173_v40 }
 0x6dd   : > { %878 = vmatpush3.bf16.msk.msra.mxu1 %vm877_vm2, %v1017_v13  ;;  %vm889_vm2 = vmpackc.low %vm493_vm1, %vm492_vm0 }
 0x6de   : > { %879 = vmatprep.subr.bf16.mxu1 %v1013_v3 }
 0x6e1   : > { %881 = vmatpush3.bf16.msk.msra.mxu1 %vm880_vm6, %v1017_v13  ;;  %vm892_vm6 = vmpackc.low %vm495_vm4, %vm494_vm3 }
 0x6e2   : > { %882 = vmatprep.subr.bf16.mxu1 %v1013_v3 }
 0x6e3   : > { %v946_v22 = vpop.eup %945 }
 0x6e4   : > { %v347_v23 = vsel %vm346_vm5, %v946_v22, 0.0 }
 0x6e5   : > { %884 = vmatpush3.bf16.msk.msra.mxu1 %vm883_vm12, %v1017_v13  ;;  %vm895_vm12 = vmpackc.low %vm497_vm10, %vm496_vm8  ;;  %v364_v40 = vsel %vm363_vm7, %v946_v22, %v347_v23 }
 0x6e6   : > { %885 = vmatprep.subr.bf16.mxu1 %v1013_v3 }
 0x6e9   : > { %887 = vmatpush3.bf16.msk.msra.mxu1 %vm886_vm15, %v1017_v13 }
 0x6ea   : > { %888 = vmatprep.subr.bf16.mxu1 %v1013_v3 }
 0x6ed   : > { %890 = vmatpush3.bf16.msk.msra.mxu1 %vm889_vm2, %v1017_v13 }
 0x6ee   : > { %891 = vmatprep.subr.bf16.mxu1 %v1013_v3 }
 0x6f1   : > { %893 = vmatpush3.bf16.msk.msra.mxu1 %vm892_vm6, %v1017_v13 }
 0x6f2   : > { %894 = vmatprep.subr.bf16.mxu1 %v1013_v3  ;;  %v381_v3 = vsel %vm380_vm9, %v946_v22, %v364_v40 }
 0x6f3   : > { %v398_v47 = vsel %vm397_vm11, %v946_v22, %v381_v3 }
 0x6f5   : > { %896 = vmatpush3.bf16.msk.msra.mxu1 %vm895_vm12, %v1017_v13 }
 0x75e   : > { %v409_v25 = vpop.xlane.xlu1 %408 }
 0x75f   : > { %v410_v27 = vcvt.f32.s32 %v409_v25 }
 0x761   : > { %v413_v28 = vadd.s32 %v412_v26, %v410_v27 }
 0x763   : > { %vm414_vm5 = vcmp.eq.s32.totalorder %v1271_v50, %v413_v28 }
 0x764   : > { %v415_v58 = vsel %vm414_vm5, %v946_v22, %v398_v47 }
 0x765   : > { %416 = vadd.xlane.f32.xlu0 %v415_v58  ;;  %839 = vmatmul.mubr.f32.vlgmr.msra.gmra.mrb[0].mxu1 %v415_v58 }
 0x7f2   : > { %v417_v59 = vpop.xlane.xlu0 %416 }
 0x7f3   : > { %947 = vrcp.f32 %v417_v59 }
 0x7fd   : > { %v948_v7 = vpop.eup %947 }
 0x838   : > { %v596_v29 = vpop.f32.mrb[0].mxu1 }
 0x839   : > { %v601_v8 = vmul.f32 %v948_v7, %v596_v29  ;;  %v840_v19 = vpop.f32.mrb[1].mxu1 }
 0x83b   : > { %v602_v30 = vadd.f32 1e-05, %v601_v8 }
 0x83d   : > { %v603_v20 = vmin.f32 %v602_v30, 1.0 }
 0x83f   : > { %604 = vst [vmem:[%s161_s24] sm:$0xff] %v603_v20 }
 0x840   : > { %962 = shalt.err (!%p959_p3)
}
 0x841   : > { %s963_s6 = scalar_lea.hbm %s1328_s28, 128  ;;  %s967_s9 = scalar_lea.hbm %s1373_s3, 256 }
 0x842   : > { %p964_p4 = scmp.ne.s32.totalorder %s1328_s28, %s963_s6  ;;  %p968_p9 = scmp.lt.u32.totalorder %s1328_s28, %s1373_s3 }
 0x843   : > { %p969_p10 = scmp.lt.u32.totalorder %s967_s9, %s963_s6  ;;  %p971_p12 = scmp.lt.u32.totalorder %s963_s6, %s1328_s28 }
 0x844   : > { %p965_p7 = pnand %p964_p4, %p1077_p5 }
 0x845   : > { %p970_p11 = por %p969_p10, %p968_p9 }
 0x846   : > { %p966_p8 = pneg %p965_p7 }
 0x847   : > { %p972_p13 = por %p971_p12, %p970_p11 }
 0x849   : > { %p973_p0 = pnand %p972_p13, %p966_p8 }
 0x84b   : > { %976 = shalt.err (!%p973_p0)
}
 0x84c   : > { %897 = dma.vmem_to_hbm [thread:$0]  (%p1077_p5), %s1330_s25, 128, %s1328_s28, %s606_s29  }
 0x84d PF: > { %p903_p1 = scmp.ge.s32.totalorder %s1011_s15, 2  ;;  %s631_s17 = sand.u32 1, %s999_s12  }
 0x84e   : > { %s632_s19 = scalar_lea.sflag [#allocation3], %s631_s17 }
 0x84f   : > { %p900_p2 = pnand %p903_p1, %p1081_p6 }
 0x851   : > { %994 = dma.done.wait (!%p900_p2), %s632_s19, 128  }
 0x852   : > { %996 = vsyncadd (!%p900_p2), %s632_s19, 4294967168  ;;  %p13_p3 = scmp.ge.s32.totalorder %s1064_s18, 4   ;;  %s1378_s12 = smov %s1003_s13 }
 0x853   : > { %s1379_s13 = smov %s1007_s14  ;;  %s1380_s14 = smov %s1075_s21 }
 0x854   : > { %s1381_s15 = smov %s1064_s18  ;;  %15 = sbr.rel (!%p13_p3) target bundleno = 3 (0x3), region = 67 }
 0x85b   :  { %637 = vsyncpa [#allocation3], 1 }
 0x85c   :  { %639 = vsyncpa [#allocation3 + $0x1], 1 }

</bundles_post_ra>
